<compile_context>
chip_gen: v5e
topology: v5e:2x2
jax: 0.10.0
libtpu: 0.0.40
codegen_flags: <defaults>
</compile_context>

<pallas_src>
import functools

import jax
import jax.numpy as jnp
from jax.experimental import pallas as pl
from jax.experimental.pallas import tpu as pltpu


def _round_up(x, m):
    return -(-x // m) * m


def _focal_pow(base, gamma):
    """(1 - pt) ** gamma, strength-reduced for small integer gamma."""
    g = float(gamma)
    gi = int(g)
    if g == gi and 0 <= gi <= 8:
        if gi == 0:
            return jnp.ones_like(base)
        out = base
        for _ in range(gi - 1):
            out = out * base
        return out
    # base >= 0 is guaranteed (ce is clamped), so float pow is NaN-safe here.
    return base ** g


def _focal_tile(logits_ref, tgt_ref, alpha_ref, *, gamma, col0, n_valid):
    """Lane-dense per-tile focal loss: returns (1, T) f32, padded columns zeroed."""
    x = logits_ref[...].astype(jnp.float32)        # (C, T): classes on sublanes, samples on lanes
    tgt = tgt_ref[...]                             # (1, T) int32
    alpha = alpha_ref[...].astype(jnp.float32)     # (C, 1)

    c, t = x.shape
    class_ids = jax.lax.broadcasted_iota(jnp.int32, (c, t), 0)
    onehot = class_ids == tgt                      # (C, T) bool

    # Numerically-stable log-sum-exp over classes (sublane axis).
    m = jnp.max(x, axis=0, keepdims=True)                                    # (1, T)
    lse = m + jnp.log(jnp.sum(jnp.exp(x - m), axis=0, keepdims=True))        # (1, T)

    # One-hot "gather" of target logit and per-class alpha (no dynamic gather).
    logit_t = jnp.sum(jnp.where(onehot, x, 0.0), axis=0, keepdims=True)      # (1, T)
    alpha_t = jnp.sum(jnp.where(onehot, alpha, 0.0), axis=0, keepdims=True)  # (1, T)

    # Clamp: fp roundoff can give ce < 0 -> pt > 1 -> negative base in the pow.
    ce = jnp.maximum(lse - logit_t, 0.0)
    pt = jnp.exp(-ce)
    focal = alpha_t * _focal_pow(1.0 - pt, gamma) * ce                       # (1, T)

    # Mask padded samples (global column index >= n_valid); computed in-kernel,
    # no extra HBM stream.
    col = col0 + jax.lax.broadcasted_iota(jnp.int32, (1, t), 1)
    return jnp.where(col < n_valid, focal, 0.0)


def _focal_sum_kernel(logits_ref, tgt_ref, alpha_ref, out_ref, *,
                      gamma, n_valid, tiles_per_core, tile):
    core = pl.program_id(0)
    step = pl.program_id(1)

    @pl.when(step == 0)
    def _init():
        out_ref[...] = jnp.zeros_like(out_ref)

    col0 = (core * tiles_per_core + step) * tile
    focal = _focal_tile(logits_ref, tgt_ref, alpha_ref,
                        gamma=gamma, col0=col0, n_valid=n_valid)
    # Lane-dense resident per-core accumulator (1, 1, T); reduced in wrapper.
    out_ref[...] += focal[None, :, :]


def _focal_elem_kernel(logits_ref, tgt_ref, alpha_ref, out_ref, *,
                       gamma, n_valid, tile):
    col0 = pl.program_id(0) * tile
    out_ref[...] = _focal_tile(logits_ref, tgt_ref, alpha_ref,
                               gamma=gamma, col0=col0, n_valid=n_valid)


def focal_loss(logits, targets, alpha=None, *, gamma=2.0, reduction="mean",
               num_cores=2, vmem_budget_bytes=24 * 1024 * 1024):
    """logits: [N, C] float, targets: [N] int, alpha: [C] float or None.

    Matches torch FocalLoss.forward for reduction in {'none', 'sum', 'mean'}.
    """
    assert reduction in ("none", "sum", "mean")
    n, c = logits.shape
    itemsize = jnp.dtype(logits.dtype).itemsize

    if alpha is None:
        alpha_vec = jnp.ones((c,), jnp.float32)
    else:
        alpha_vec = jnp.asarray(alpha, jnp.float32).reshape(-1)
        if alpha_vec.shape[0] == 1:
            alpha_vec = jnp.broadcast_to(alpha_vec, (c,))

    # ---- tile selection (samples per block, on the lane axis) ----------------
    # Per-sample VMEM bytes across all streams, f32-conservative, including the
    # 8-sublane padding of the (1, tile) targets / accumulator blocks and 2x
    # double buffering per stream.
    per_sample_bytes = 2 * _round_up(c, 8) * 4 + 2 * 8 * 4 + 2 * 8 * 4
    tile = max(128, (vmem_budget_bytes // per_sample_bytes) // 128 * 128)
    tile = min(tile, 128 * 1024)
    # TODO(synk): for vocab-scale C where C*tile no longer fits VMEM, add a
    # class-tile grid axis with an online (streaming) logsumexp.

    if reduction == "none":
        tile = min(tile, max(128, _round_up(n, 128)))
        n_tiles = -(-n // tile)
        n_pad = n_tiles * tile
    else:
        per_core = -(-n // num_cores)
        tile = min(tile, max(128, _round_up(per_core, 128)))
        tiles_per_core = -(-per_core // tile)
        n_pad = num_cores * tiles_per_core * tile

    # ---- lane-dense transposed layout + padding (layout plumbing) ------------
    # Keep the native dtype in HBM; the cast to f32 happens in-kernel.
    logits_t = jnp.transpose(logits)                            # (C, N)
    tgt_row = targets.astype(jnp.int32).reshape(1, n)
    if n_pad != n:
        logits_t = jnp.pad(logits_t, ((0, 0), (0, n_pad - n)))
        tgt_row = jnp.pad(tgt_row, ((0, 0), (0, n_pad - n)))
    alpha_col = alpha_vec.reshape(c, 1)

    vmem_needed = per_sample_bytes * tile + 2 * 1024 * 1024
    vmem_limit = int(min(max(vmem_needed, 32 * 1024 * 1024), 56 * 1024 * 1024))

    cost = pl.CostEstimate(
        flops=int(12 * n_pad * c + 16 * n_pad),
        transcendentals=int(n_pad * (c + 2)),
        bytes_accessed=int(n_pad * c * itemsize + n_pad * 4 + c * 4 + n_pad * 4),
    )

    if reduction == "none":
        kernel = functools.partial(_focal_elem_kernel, gamma=gamma,
                                   n_valid=n, tile=tile)
        out = pl.pallas_call(
            kernel,
            out_shape=jax.ShapeDtypeStruct((1, n_pad), jnp.float32),
            grid_spec=pltpu.PrefetchScalarGridSpec(
                num_scalar_prefetch=0,
                grid=(n_tiles,),
                in_specs=[
                    pl.BlockSpec((c, tile), lambda i: (0, i)),   # logits [C, N]
                    pl.BlockSpec((1, tile), lambda i: (0, i)),   # targets [1, N]
                    pl.BlockSpec((c, 1), lambda i: (0, 0)),      # alpha (shared)
                ],
                out_specs=pl.BlockSpec((1, tile), lambda i: (0, i)),
            ),
            compiler_params=pltpu.CompilerParams(
                dimension_semantics=("parallel",),
                vmem_limit_bytes=vmem_limit,
            ),
            cost_estimate=cost,
        )(logits_t, tgt_row, alpha_col)
        return out[0, :n]

    kernel = functools.partial(_focal_sum_kernel, gamma=gamma, n_valid=n,
                               tiles_per_core=tiles_per_core, tile=tile)
    out = pl.pallas_call(
        kernel,
        out_shape=jax.ShapeDtypeStruct((num_cores, 1, tile), jnp.float32),
        grid_spec=pltpu.PrefetchScalarGridSpec(
            num_scalar_prefetch=0,
            grid=(num_cores, tiles_per_core),
            in_specs=[
                pl.BlockSpec((c, tile),
                             lambda core, i: (0, core * tiles_per_core + i)),   # logits [C, N]
                pl.BlockSpec((1, tile),
                             lambda core, i: (0, core * tiles_per_core + i)),   # targets [1, N]
                pl.BlockSpec((c, 1), lambda core, i: (0, 0)),                   # alpha (shared)
            ],
            out_specs=pl.BlockSpec((1, 1, tile), lambda core, i: (core, 0, 0)), # per-core partials
        ),
        compiler_params=pltpu.CompilerParams(
            dimension_semantics=("parallel", "arbitrary"),
            vmem_limit_bytes=vmem_limit,
        ),
        cost_estimate=cost,
    )(logits_t, tgt_row, alpha_col)

    total = jnp.sum(out)
    if reduction == "sum":
        return total
    # 'mean': unweighted /N, matching `focal_loss.mean()` in the torch module.
    return total / jnp.float32(n)


def focal_loss_ref_per_sample(logits, targets, alpha, gamma=2.0):
    """Pure-JAX reference matching the torch module with reduction='none'."""
    logp = jax.nn.log_softmax(logits.astype(jnp.float32), axis=-1)
    ce = -jnp.take_along_axis(logp, targets[:, None], axis=-1)[:, 0]
    pt = jnp.exp(-ce)
    a = alpha[targets]
    return a * (1.0 - pt) ** gamma * ce


def focal_loss_ref(logits, targets, alpha, gamma=2.0):
    """Pure-JAX reference matching the torch module defaults (reduction='mean')."""
    return jnp.mean(focal_loss_ref_per_sample(logits, targets, alpha, gamma))


if __name__ == "__main__":
    key = jax.random.PRNGKey(0)
    N, C = 32, 8  # batch, num classes
    k1, k2 = jax.random.split(key)

    logits = jax.random.normal(k1, (N, C), dtype=jnp.float32)
    targets = jax.random.randint(k2, (N,), 0, C, dtype=jnp.int32)

    # Deterministic class weights (alpha); gamma=2, reduction='mean' (module defaults).
    alpha = jnp.linspace(0.5, 1.5, C, dtype=jnp.float32)
    gamma = 2.0

    # reduction='mean' (module default)
    loss = focal_loss(logits, targets, alpha, gamma=gamma, reduction="mean")
    loss = jax.block_until_ready(loss)
    ref_mean = focal_loss_ref(logits, targets, alpha, gamma=gamma)
    assert jnp.allclose(loss, ref_mean, rtol=1e-5, atol=1e-6), (loss, ref_mean)

    # reduction='none' (per-sample)
    per_sample = focal_loss(logits, targets, alpha, gamma=gamma, reduction="none")
    per_sample = jax.block_until_ready(per_sample)
    ref_none = focal_loss_ref_per_sample(logits, targets, alpha, gamma=gamma)
    assert per_sample.shape == (N,)
    assert jnp.allclose(per_sample, ref_none, rtol=1e-5, atol=1e-6), (per_sample, ref_none)

    print("KERNEL_OK")
</pallas_src>

<mosaic_0001>
module attributes {stable_mosaic.version = 11 : i64} {
  func.func @_focal_sum_kernel(%arg0: i32, %arg1: i32, %arg2: memref<8x128xf32, #tpu.memory_space<vmem>>, %arg3: memref<1x128xi32, #tpu.memory_space<vmem>>, %arg4: memref<8x1xf32, #tpu.memory_space<vmem>>, %arg5: memref<1x1x128xf32, #tpu.memory_space<vmem>>) attributes {dimension_semantics = [#tpu.dimension_semantics<parallel>, #tpu.dimension_semantics<arbitrary>], iteration_bounds = array<i64: 2, 1>, scalar_prefetch = 0 : i64, scratch_operands = 0 : i64, tpu.core_type = #tpu.core_type<tc>, window_params = [{transform_indices = @transform_0, window_bounds = array<i64: 8, 128>}, {transform_indices = @transform_1, window_bounds = array<i64: 1, 128>}, {pipeline_mode = #tpu.pipeline_mode<synchronous>, transform_indices = @transform_2, window_bounds = array<i64: 8, 1>}, {transform_indices = @transform_3, window_bounds = array<i64: 1, 1, 128>}]} {
    %c0_i32 = arith.constant 0 : i32
    %0 = arith.cmpi eq, %arg1, %c0_i32 : i32
    %1 = arith.extui %0 : i1 to i32
    %c0_i32_0 = arith.constant 0 : i32
    %2 = arith.cmpi ne, %1, %c0_i32_0 : i32
    scf.if %2 {
      %cst_21 = arith.constant 0.000000e+00 : f32
      %53 = vector.broadcast %cst_21 : f32 to vector<1x1x128xf32>
      %c0_22 = arith.constant 0 : index
      %c0_23 = arith.constant 0 : index
      %c0_24 = arith.constant 0 : index
      %54 = vector.load %arg5[%c0_22, %c0_23, %c0_24] : memref<1x1x128xf32, #tpu.memory_space<vmem>>, vector<1x1x128xf32>
      tpu.vector_store %arg5[%c0_22, %c0_23, %c0_24], %53 {strides = array<i32>} : memref<1x1x128xf32, #tpu.memory_space<vmem>>, vector<1x1x128xf32>,
    } else {
    }
    %c1_i32 = arith.constant 1 : i32
    %3 = arith.muli %arg0, %c1_i32 : i32
    %4 = arith.addi %3, %arg1 : i32
    %c128_i32 = arith.constant 128 : i32
    %5 = arith.muli %4, %c128_i32 : i32
    %c0 = arith.constant 0 : index
    %c0_1 = arith.constant 0 : index
    %6 = vector.load %arg2[%c0, %c0_1] : memref<8x128xf32, #tpu.memory_space<vmem>>, vector<8x128xf32>
    %c0_2 = arith.constant 0 : index
    %c0_3 = arith.constant 0 : index
    %7 = vector.load %arg3[%c0_2, %c0_3] : memref<1x128xi32, #tpu.memory_space<vmem>>, vector<1x128xi32>
    %c0_4 = arith.constant 0 : index
    %c0_5 = arith.constant 0 : index
    %8 = vector.load %arg4[%c0_4, %c0_5] : memref<8x1xf32, #tpu.memory_space<vmem>>, vector<8x1xf32>
    %9 = tpu.iota {dimensions = array<i32: 0>} : vector<8x128xi32>
    %10 = vector.broadcast %7 : vector<1x128xi32> to vector<8x128xi32>
    %11 = arith.cmpi eq, %9, %10 : vector<8x128xi32>
    %cst = arith.constant dense<0xFF800000> : vector<128xf32>
    %12 = vector.multi_reduction <maximumf>, %6, %cst [0] : vector<8x128xf32> to vector<128xf32>
    %13 = vector.shape_cast %12 : vector<128xf32> to vector<1x128xf32>
    %14 = vector.broadcast %13 : vector<1x128xf32> to vector<8x128xf32>
    %15 = arith.subf %6, %14 : vector<8x128xf32>
    %16 = math.exp %15 : vector<8x128xf32>
    %cst_6 = arith.constant dense<0.000000e+00> : vector<128xf32>
    %17 = vector.multi_reduction <add>, %16, %cst_6 [0] : vector<8x128xf32> to vector<128xf32>
    %18 = vector.shape_cast %17 : vector<128xf32> to vector<1x128xf32>
    %19 = math.log %18 : vector<1x128xf32>
    %20 = arith.addf %13, %19 : vector<1x128xf32>
    %cst_7 = arith.constant 0.000000e+00 : f32
    %21 = vector.broadcast %cst_7 : f32 to vector<8x128xf32>
    %22 = arith.select %11, %6, %21 : vector<8x128xi1>, vector<8x128xf32>
    %cst_8 = arith.constant dense<0.000000e+00> : vector<128xf32>
    %23 = vector.multi_reduction <add>, %22, %cst_8 [0] : vector<8x128xf32> to vector<128xf32>
    %24 = vector.shape_cast %23 : vector<128xf32> to vector<1x128xf32>
    %cst_9 = arith.constant 0.000000e+00 : f32
    %25 = vector.shape_cast %8 : vector<8x1xf32> to vector<8x1xf32>
    %26 = vector.broadcast %25 : vector<8x1xf32> to vector<8x128xf32>
    %27 = vector.broadcast %cst_9 : f32 to vector<8x128xf32>
    %28 = arith.select %11, %26, %27 : vector<8x128xi1>, vector<8x128xf32>
    %cst_10 = arith.constant dense<0.000000e+00> : vector<128xf32>
    %29 = vector.multi_reduction <add>, %28, %cst_10 [0] : vector<8x128xf32> to vector<128xf32>
    %30 = vector.shape_cast %29 : vector<128xf32> to vector<1x128xf32>
    %31 = arith.subf %20, %24 : vector<1x128xf32>
    %cst_11 = arith.constant 0.000000e+00 : f32
    %32 = vector.broadcast %cst_11 : f32 to vector<1x128xf32>
    %33 = arith.maximumf %31, %32 : vector<1x128xf32>
    %cst_12 = arith.constant 0.000000e+00 : f32
    %34 = vector.broadcast %cst_12 : f32 to vector<1x128xf32>
    %35 = arith.subf %34, %33 : vector<1x128xf32>
    %36 = math.exp %35 : vector<1x128xf32>
    %cst_13 = arith.constant 1.000000e+00 : f32
    %37 = vector.broadcast %cst_13 : f32 to vector<1x128xf32>
    %38 = arith.subf %37, %36 : vector<1x128xf32>
    %39 = arith.mulf %38, %38 : vector<1x128xf32>
    %40 = arith.mulf %30, %39 : vector<1x128xf32>
    %41 = arith.mulf %40, %33 : vector<1x128xf32>
    %42 = tpu.iota {dimensions = array<i32: 1>} : vector<1x128xi32>
    %43 = vector.broadcast %5 : i32 to vector<1x128xi32>
    %44 = arith.addi %43, %42 : vector<1x128xi32>
    %c32_i32 = arith.constant 32 : i32
    %45 = vector.broadcast %c32_i32 : i32 to vector<1x128xi32>
    %46 = arith.cmpi slt, %44, %45 : vector<1x128xi32>
    %cst_14 = arith.constant 0.000000e+00 : f32
    %47 = vector.broadcast %cst_14 : f32 to vector<1x128xf32>
    %48 = arith.select %46, %41, %47 : vector<1x128xi1>, vector<1x128xf32>
    %c0_15 = arith.constant 0 : index
    %c0_16 = arith.constant 0 : index
    %c0_17 = arith.constant 0 : index
    %49 = vector.load %arg5[%c0_15, %c0_16, %c0_17] : memref<1x1x128xf32, #tpu.memory_space<vmem>>, vector<1x1x128xf32>
    %50 = vector.shape_cast %48 : vector<1x128xf32> to vector<1x1x128xf32>
    %51 = arith.addf %49, %50 : vector<1x1x128xf32>
    %c0_18 = arith.constant 0 : index
    %c0_19 = arith.constant 0 : index
    %c0_20 = arith.constant 0 : index
    %52 = vector.load %arg5[%c0_18, %c0_19, %c0_20] : memref<1x1x128xf32, #tpu.memory_space<vmem>>, vector<1x1x128xf32>
    tpu.vector_store %arg5[%c0_18, %c0_19, %c0_20], %51 {strides = array<i32>} : memref<1x1x128xf32, #tpu.memory_space<vmem>>, vector<1x1x128xf32>,
    return
  }
  func.func @transform_0(%arg0: i32, %arg1: i32) -> (i32, i32) {
    %c1_i32 = arith.constant 1 : i32
    %0 = arith.muli %arg0, %c1_i32 : i32
    %1 = arith.addi %0, %arg1 : i32
    %c0_i32 = arith.constant 0 : i32
    %c0_i32_0 = arith.constant 0 : i32
    return %c0_i32, %1 : i32, i32
  }
  func.func @transform_1(%arg0: i32, %arg1: i32) -> (i32, i32) {
    %c1_i32 = arith.constant 1 : i32
    %0 = arith.muli %arg0, %c1_i32 : i32
    %1 = arith.addi %0, %arg1 : i32
    %c0_i32 = arith.constant 0 : i32
    %c0_i32_0 = arith.constant 0 : i32
    return %c0_i32, %1 : i32, i32
  }
  func.func @transform_2(%arg0: i32, %arg1: i32) -> (i32, i32) {
    %c0_i32 = arith.constant 0 : i32
    %c0_i32_0 = arith.constant 0 : i32
    %c0_i32_1 = arith.constant 0 : i32
    return %c0_i32, %c0_i32_0 : i32, i32
  }
  func.func @transform_3(%arg0: i32, %arg1: i32) -> (i32, i32, i32) {
    %c0_i32 = arith.constant 0 : i32
    %c0_i32_0 = arith.constant 0 : i32
    %c0_i32_1 = arith.constant 0 : i32
    return %arg0, %c0_i32, %c0_i32_0 : i32, i32, i32
  }
}

</mosaic_0001>

<bundles_post_ra>
// kernel: tpu_custom_call.1
= control target key start
LH: loop header
LB: loop body
LE: loop exit
PB: predicated region body
PF: predicated region fallthrough
CT: control target
= control target key end

     0   :  { %8 = vsyncpa [#allocation3], 0  ;;  %s747_s0 = inlined_call_operand.hbm [shape: f32[8,256], index: 0, kind: input, shape index: {}]   ;;  %s748_s1 = inlined_call_operand.vmem [shape: s32[1,256], index: 1, kind: input, shape index: {}]   ;;  %s749_s2 = inlined_call_operand.vmem [shape: f32[8,1], index: 2, kind: input, shape index: {}]   ;;  %s750_s3 = inlined_call_operand.hbm [shape: f32[2,1,128], index: 3, kind: output, shape index: {}]  }
   0x1   :  { %10 = vsyncpa [#allocation3 + $0x1], 0 }
   0x2   :  { %11 = vsyncpa [#allocation4], 0 }
   0x3   :  { %13 = vsyncpa [#allocation4 + $0x1], 0  ;;  %s609_s12 = smov 0   ;;  %s611_s13 = smov 0  }
   0x4   :  { %s613_s14 = smov 0   ;;  %s615_s15 = smov 0  }
   0x5   :  { %s617_s16 = smov 0   ;;  %s619_s17 = smov 0  }
   0x6 LB: > { %s390_s18 = sadd.s32 4294967295, %s585_s17   ;;  %s391_s19 = sadd.s32 4294967294, %s585_s17   ;;  %s585_s17 = sphi %s619_s17, %s19_s17   ;;  %s581_s16 = sphi %s617_s16, %s759_s16   ;;  %s577_s15 = sphi %s615_s15, %s758_s15   ;;  %s573_s14 = sphi %s613_s14, %s757_s14   ;;  %s569_s13 = sphi %s611_s13, %s756_s13   ;;  %s565_s12 = sphi %s609_s12, %s755_s12  }
   0x7   : > { %s31_s20 = sadd.s32 1, %s581_s16  ;;  %s40_s21 = sadd.s32 1, %s573_s14 }
   0x8   : > { %p33_p0 = scmp.ge.s32.totalorder %s31_s20, 2  ;;  %p47_p1 = scmp.ne.s32.totalorder %s573_s14, %s569_s13 }
   0x9   : > { %p48_p2 = scmp.eq.s32.totalorder %s585_s17, 0  ;;  %p53_p3 = scmp.ne.s32.totalorder %s569_s13, %s565_s12 }
   0xa   : > { %s761_s20 = smov (%p33_p0, %s31_s20), 0  ;;  %p54_p5 = scmp.eq.s32.totalorder %s390_s18, 0 }
   0xb   : > { %p650_p4 = por %p48_p2, %p47_p1  ;;  %s37_s23 = ssub.s32 %s581_s16, %s761_s20 }
   0xc   : > { %p126_p6 = scmp.eq.s32.totalorder %s390_s18, 1  ;;  %p38_p7 = scmp.eq.s32.totalorder %s37_s23, 0 }
   0xd   : > { %p656_p8 = por %p54_p5, %p53_p3  ;;  %p132_p10 = scmp.eq.s32.totalorder %s391_s19, 1 }
   0xe   : > { %p660_p9 = por %p126_p6, %p47_p1  ;;  %p393_p12 = scmp.ge.s32.totalorder %s585_s17, 2 }
   0xf   : > { %s665_s26 = scalar_select %p38_p7, %s573_s14, %s40_s21  }
  0x10   : > { %p667_p11 = por %p132_p10, %p53_p3  ;;  %p413_p13 = scmp.lt.s32.totalorder %s585_s17, 2 }
  0x11   : > { %s155_s28 = sand.u32 1, %s573_s14   ;;  %s395_s30 = sshll.u32 %s581_s16, 3 }
  0x12   : > { %s394_s29 = sshll.u32 %s155_s28, 3  ;;  %s164_s6 = scalar_lea.hbm %s747_s0, %s395_s30 }
  0x13   : > { %s159_s7 = scalar_lea.vmem [#allocation2], %s394_s29  ;;  %s166_s9 = sshll.u32 %s164_s6, 4  ;;  %s167_s9 = int_to_ptr.hbm [resolvable:$true] %s166_s9 }
  0x14   : > { %s168_s8 = sshll.u32 %s159_s7, 4  ;;  %p406_p0 = pnand %p413_p13, %p650_p4  ;;  %s169_s8 = int_to_ptr.vmem [resolvable:$true] %s168_s8 }
  0x15   : > { %p396_p1 = scmp.ge.s32.totalorder %s585_s17, 1  ;;  %p181_p2 = scmp.lt.s32.totalorder %s585_s17, 3 }
  0x16   : > { %s156_s10 = scalar_lea.sflag [#allocation3], %s155_s28 }
  0x17   : > { %408 = dma.hbm_to_vmem [thread:$0]  (!%p406_p0), %s167_s9, 128, %s169_s8, %s156_s10  }
  0x18   : > { %p182_p3 = pnand %p396_p1, %p181_p2 }
  0x19   : > { %s683_s11 = sand.u32 (!%p182_p3), 1, %s569_s13  }
  0x1a   : > { %185 = sbr.rel (%p182_p3) target bundleno = 172 (0xac), region = 32  ;;  %s397_s18 = sshll.u32 (!%p182_p3), %s683_s11, 3 }
  0x1b   : > { %s188_s19 = scalar_lea.sflag (!%p182_p3), [#allocation3], %s683_s11  ;;  %s191_s21 = scalar_lea.vmem (!%p182_p3), [#allocation2], %s397_s18 }
  0x1f   : > { %556 = dma.done.wait (%p656_p8), %s188_s19, 128  }
  0x20   : > { %558 = vsyncadd (%p656_p8), %s188_s19, 4294967168  ;;  %p220_p4 = scmp.lt.s32.totalorder %s577_s15, 1  ;;  %v587_v0 = vmov 0   ;;  %v233_v1 = vld [vmem:[%s749_s2] sm:$0xff]  ;;  %v234_v13 = vlaneseq  ;;  %s701_s24 = scalar_lea.vmem [#allocation5], %s683_s11  ;;  %v588_v31 = vmov 0.0  }
  0x21   : > { %465 = vset.pattern.permute.xlu0 %v587_v0  ;;  %v231_v2 = vld [vmem:[%s191_s21] sm:$0xff]  ;;  %228 = vst [vmem:[%s701_s24] sm:$0x1] %v588_v31  ;;  %s398_s5 = sshll.u32 %s577_s15, 7  ;;  %s302_s8 = scalar_lea.hbm %s750_s3, %s577_s15 }
  0x22   : > { %s221_s22 = scalar_select %p220_p4, %s577_s15, 1  ;;  %265 = vperm.xlu0 %465, %v233_v1   ;;  %v238_v3 = vrot.slane %v231_v2, 4  ;;  %v235_v15 = vshrl.u32 %v234_v13, 7  ;;  %v285_v43 = vand.u32 127, %v234_v13  ;;  %v286_v44 = vstv %s398_s5 }
  0x23   : > { %s304_s9 = sshll.u32 %s701_s24, 4  ;;  %s306_s10 = sshll.u32 %s302_s8, 4  ;;  %s305_s9 = int_to_ptr.vmem [resolvable:$true] %s304_s9  ;;  %s307_s10 = int_to_ptr.hbm [resolvable:$true] %s306_s10 }
  0x24   : > { %s222_s29 = scalar_lea.vmem %s748_s1, %s221_s22  ;;  %v239_v4 = vmax.f32 %v231_v2, %v238_v3  ;;  %v287_v48 = vadd.s32 %v286_v44, %v285_v43  ;;  %s294_s18 = scalar_lea.sflag [#allocation4], %s683_s11 }
  0x25   : > { %v466_v16 = vld [vmem:[%s222_s29] ss:$0 sm:$0xff]  ;;  %s517_s19 = sshra.s32 %s307_s10, 4  ;;  %s523_s23 = scalar_lea.hbm %s750_s3, 2  ;;  %s518_s19 = int_to_ptr.hbm [resolvable:$true] %s517_s19 }
  0x26   : > { %v240_v5 = vrot.slane %v239_v4, 2  ;;  %vm237_vm0 = vcmp.eq.s32.totalorder %v235_v15, %v466_v16  ;;  %vm288_vm1 = vcmp.lt.s32.totalorder %v287_v48, 32  ;;  %s519_s21 = scalar_lea.hbm %s518_s19, 1  ;;  %p524_p8 = scmp.lt.s32.totalorder %s518_s19, %s750_s3 }
  0x27   : > { %v256_v19 = vsel %vm237_vm0, %v231_v2, 0.0  ;;  %p520_p5 = scmp.ne.s32.totalorder %s518_s19, %s519_s21  ;;  %p525_p10 = scmp.lt.s32.totalorder %s523_s23, %s519_s21 }
  0x28   : > { %v241_v6 = vmax.f32 %v239_v4, %v240_v5  ;;  %v257_v21 = vrot.slane %v256_v19, 4  ;;  %v290_v52 = vld [vmem:[%s701_s24] sm:$0x1] }
  0x29   : > { %p521_p6 = pnand %p520_p5, %p660_p9  ;;  %p526_p13 = por %p525_p10, %p524_p8 }
  0x2a   : > { %v242_v7 = vrot.slane %v241_v6, 1  ;;  %v258_v23 = vadd.f32 %v257_v21, %v256_v19 }
  0x2b   : > { %p522_p7 = pneg %p521_p6 }
  0x2c   : > { %v243_v8 = vmax.f32 %v241_v6, %v242_v7  ;;  %v259_v24 = vrot.slane %v258_v23, 2 }
  0x2d   : > { %p527_p0 = pnand %p526_p13, %p522_p7 }
  0x2e   : > { %v244_v9 = vsub.f32 %v231_v2, %v243_v8  ;;  %v260_v25 = vadd.f32 %v259_v24, %v258_v23 }
  0x30   : > { %v245_v10 = vmul.f32 1.442695, %v244_v9  ;;  %v261_v28 = vrot.slane %v260_v25, 1 }
  0x32   : > { %467 = vpow2.f32 %v245_v10  ;;  %v262_v30 = vadd.f32 %v261_v28, %v260_v25 }
  0x38   : > { %v468_v11 = vpop.eup %467 }
  0x39   : > { %v247_v12 = vrot.slane %v468_v11, 4 }
  0x3b   : > { %v248_v14 = vadd.f32 %v468_v11, %v247_v12 }
  0x3d   : > { %v249_v17 = vrot.slane %v248_v14, 2 }
  0x3f   : > { %v250_v18 = vadd.f32 %v249_v17, %v248_v14 }
  0x41   : > { %v251_v20 = vrot.slane %v250_v18, 1 }
  0x43   : > { %v252_v22 = vadd.f32 %v251_v20, %v250_v18 }
  0x45   : > { %469 = vlog2.f32 %v252_v22 }
  0x4b   : > { %v470_v26 = vpop.eup %469 }
  0x4c   : > { %v254_v27 = vmul.f32 0.6931472, %v470_v26 }
  0x4e   : > { %v255_v29 = vadd.f32 %v254_v27, %v243_v8 }
  0x50   : > { %v275_v32 = vsub.f32 %v255_v29, %v262_v30 }
  0x52   : > { %v276_v33 = vmax.f32 %v275_v32, 0.0 }
  0x54   : > { %v277_v34 = vsub.f32 0.0, %v276_v33 }
  0x56   : > { %v278_v35 = vmul.f32 1.442695, %v277_v34 }
  0x58   : > { %471 = vpow2.f32 %v278_v35 }
  0x5e   : > { %v472_v39 = vpop.eup %471 }
  0x5f   : > { %v280_v42 = vsub.f32 1.0, %v472_v39 }
  0x61   : > { %v281_v47 = vmul.f32 %v280_v42, %v280_v42 }
  0x94   : > { %v266_v36 = vpop.permute.xlu0 %265 }
  0x95   : > { %v268_v37 = vsel %vm237_vm0, %v266_v36, 0.0 }
  0x96   : > { %v269_v38 = vrot.slane %v268_v37, 4 }
  0x98   : > { %v270_v40 = vadd.f32 %v269_v38, %v268_v37 }
  0x9a   : > { %v271_v41 = vrot.slane %v270_v40, 2 }
  0x9c   : > { %v272_v45 = vadd.f32 %v271_v41, %v270_v40 }
  0x9e   : > { %v273_v46 = vrot.slane %v272_v45, 1 }
  0xa0   : > { %v274_v49 = vadd.f32 %v273_v46, %v272_v45 }
  0xa2   : > { %v282_v50 = vmul.f32 %v281_v47, %v274_v49 }
  0xa4   : > { %v283_v51 = vmul.f32 %v282_v50, %v276_v33 }
  0xa6   : > { %v289_v53 = vsel %vm288_vm1, %v283_v51, 0.0 }
  0xa7   : > { %v291_v54 = vadd.f32 %v290_v52, %v289_v53 }
  0xa9   : > { %292 = vst [vmem:[%s701_s24] sm:$0x1] %v291_v54 }
  0xaa   : > { %530 = shalt.err (!%p527_p0)
}
  0xab   : > { %403 = dma.vmem_to_hbm [thread:$0]  (%p660_p9), %s305_s9, 16, %s307_s10, %s294_s18  }
  0xac PF: > { %s318_s11 = sand.u32 1, %s565_s12   ;;  %p410_p1 = pnand %p393_p12, %p667_p11 }
  0xad   : > { %s319_s30 = scalar_lea.sflag [#allocation4], %s318_s11 }
  0xae   : > { %p411_p2 = pneg %p410_p1 }
  0xb0   : > { %560 = dma.done.wait (%p411_p2), %s319_s30, 16  }
  0xb1   : > { %562 = vsyncadd (%p411_p2), %s319_s30, 4294967280  ;;  %s19_s17 = sadd.s32 1, %s585_s17   ;;  %s755_s12 = smov %s569_s13 }
  0xb2   : > { %p16_p3 = scmp.ge.s32.totalorder %s19_s17, 4   ;;  %s756_s13 = smov %s573_s14 }
  0xb3   : > { %s757_s14 = smov %s665_s26  ;;  %s758_s15 = smov %s581_s16 }
  0xb4   : > { %s759_s16 = smov %s761_s20  ;;  %18 = sbr.rel (!%p16_p3) target bundleno = 6 (0x6), region = 84 }
  0xb9   :  { %324 = vsyncpa [#allocation3], 1 }
  0xba   :  { %326 = vsyncpa [#allocation3 + $0x1], 1 }
  0xbb   :  { %327 = vsyncpa [#allocation4], 1 }
  0xbc   :  { %329 = vsyncpa [#allocation4 + $0x1], 1 }

</bundles_post_ra>
